<compile_context>
chip_gen: v7x
topology: tpu7x:2x2x1
jax: 0.10.0
libtpu: 0.0.40
codegen_flags: <defaults>
</compile_context>

<pallas_src>
import functools

import jax
import jax.numpy as jnp
from jax import lax
from jax.experimental import pallas as pl
from jax.experimental.pallas import tpu as pltpu

EPS = 1e-5      # torch.nn.functional.layer_norm default eps
SUBLANE = 8


def _round_up(x, m):
    return ((x + m - 1) // m) * m


def _layer_norm_fast(h, d_real):
    """LayerNorm over the last axis of a (possibly lane-padded) activation.

    Relies on the padded lanes of `h` being exactly zero (zero-padded weight
    columns + zero-padded bias), so no masking is needed.  mean and E[h^2] are
    two independent cross-lane reductions -> they can overlap on the XLU.
    Padded lanes come out nonzero (-mean*rsqrt), which is harmless: padded
    weight ROWS of the next layer are zero and the final output is sliced.
    """
    inv_d = 1.0 / float(d_real)
    s1 = jnp.sum(h, axis=-1, keepdims=True)
    s2 = jnp.sum(h * h, axis=-1, keepdims=True)
    mean = s1 * inv_d
    var = jnp.maximum(s2 * inv_d - mean * mean, 0.0)
    return (h - mean) * lax.rsqrt(var + EPS)


# ---------------- fused whole-MLP Pallas kernel ----------------

def fused_mlp_kernel(x_ref, w_ref, b_ref, o_ref, *, layer_cfgs):
    """x_ref: (tb, D); w_ref: (L_total, D, D); b_ref: (L_total, 1, D).

    Per layer (mirrors the torch forward):
        h = x @ W + b
        h = layernorm(h)                 # if ln_main
        if skip: y = relu(h); y = y @ Ws + bs
                 y = layernorm(y)        # if ln_skip (not last layer)
                 h = y + x               # residual adds the layer INPUT
        h = relu(h)                      # if act_out (not last layer)
        x = h
    Padded-batch rows (all-zero input) just produce garbage rows that are
    sliced off by the wrapper; there are no cross-row ops so they are benign.
    """
    x = x_ref[...].astype(jnp.float32)
    for (d_out, w_idx, s_idx, ln_main, ln_skip, act_out) in layer_cfgs:
        h = jnp.dot(x, w_ref[w_idx],
                    preferred_element_type=jnp.float32) + b_ref[w_idx]
        if ln_main:
            h = _layer_norm_fast(h, d_out)
        if s_idx is not None:
            y = jnp.maximum(h, 0.0)
            y = jnp.dot(y, w_ref[s_idx],
                        preferred_element_type=jnp.float32) + b_ref[s_idx]
            if ln_skip:
                y = _layer_norm_fast(y, d_out)
            h = y + x
        if act_out:
            h = jnp.maximum(h, 0.0)
        x = h
    o_ref[...] = x.astype(o_ref.dtype)


# ---------------- one-time parameter preparation (hoisted out of hot path) ---

def prepare_mlp(params, *, input_size, layers_sizes, output_size,
                layernorm, skipconnections):
    """Pad + stack all weights/biases ONCE; build the static per-layer config."""
    sizes_in = [input_size] + list(layers_sizes)
    sizes_out = list(layers_sizes) + [output_size]
    D = _round_up(max([input_size] + list(layers_sizes) + [output_size]),
                  SUBLANE)
    n = len(sizes_out)

    w_list, b_list, cfgs = [], [], []
    for i, (p, din, dout) in enumerate(zip(params, sizes_in, sizes_out)):
        is_last = i == n - 1
        w_idx = len(w_list)
        w_list.append(jnp.zeros((D, D), jnp.float32).at[:din, :dout].set(p["w"]))
        b_list.append(jnp.zeros((1, D), jnp.float32).at[0, :dout].set(p["b"]))
        ln_main = bool(layernorm and dout != 1 and (not is_last or skipconnections))
        s_idx = None
        if skipconnections and din == dout:
            s_idx = len(w_list)
            w_list.append(
                jnp.zeros((D, D), jnp.float32).at[:dout, :dout].set(p["ws"]))
            b_list.append(
                jnp.zeros((1, D), jnp.float32).at[0, :dout].set(p["bs"]))
        # skip-branch LN is NOT gated on `layernorm` in the torch module
        cfgs.append((dout, w_idx, s_idx, ln_main, not is_last, not is_last))

    w_all = jnp.stack(w_list)        # (L_total, D, D)
    b_all = jnp.stack(b_list)        # (L_total, 1, D)
    return w_all, b_all, tuple(cfgs), D


# ---------------- forward builder: single pallas_call ----------------

def build_mlp_forward(layer_cfgs, D, output_size, *, tile_b=512):
    kernel = functools.partial(fused_mlp_kernel, layer_cfgs=layer_cfgs)

    @jax.jit
    def forward(x, w_all, b_all):
        B, d_in = x.shape
        # one big tile for small batches (grid is a serial loop on v5e/v6e);
        # large batches tile at `tile_b` so v7x's 2 TCs can split the grid.
        tb = min(tile_b, _round_up(B, SUBLANE))
        b_pad = _round_up(B, tb)
        if (b_pad, D) != (B, d_in):
            x_in = jnp.zeros((b_pad, D), x.dtype).at[:B, :d_in].set(x)
        else:
            x_in = x                         # no-op at the demo shapes

        L = w_all.shape[0]
        out = pl.pallas_call(
            kernel,
            out_shape=jax.ShapeDtypeStruct((b_pad, D), x.dtype),
            grid=(b_pad // tb,),
            in_specs=[
                pl.BlockSpec((tb, D), lambda i: (i, 0)),
                pl.BlockSpec((L, D, D), lambda i: (0, 0, 0)),   # full array
                pl.BlockSpec((L, 1, D), lambda i: (0, 0, 0)),   # full array
            ],
            out_specs=pl.BlockSpec((tb, D), lambda i: (i, 0)),
            compiler_params=pltpu.CompilerParams(
                dimension_semantics=("parallel",),
                vmem_limit_bytes=32 * 1024 * 1024,   # v5e default is only 16 MiB
            ),
        )(x_in, w_all, b_all)
        return out[:B, :output_size]

    return forward


# ---------------- pure-JAX reference (unpadded, mirrors torch forward) -------

def _layer_norm_ref(x):
    mean = jnp.mean(x, axis=-1, keepdims=True)
    var = jnp.mean((x - mean) ** 2, axis=-1, keepdims=True)
    return (x - mean) * lax.rsqrt(var + EPS)


def mlp_forward_ref(x, params, *, layernorm, skipconnections):
    n = len(params)
    for i, p in enumerate(params):
        is_last = i == n - 1
        xout = x @ p["w"] + p["b"]
        possible_to_normalize = xout.ndim == 2 and xout.shape[1] != 1
        if layernorm and possible_to_normalize and (not is_last or skipconnections):
            xout = _layer_norm_ref(xout)
        if skipconnections and xout.shape == x.shape:
            y = jnp.maximum(xout, 0.0)
            y = y @ p["ws"] + p["bs"]
            if not is_last:
                y = _layer_norm_ref(y)
            x = y + x
        else:
            x = xout
        if not is_last:
            x = jnp.maximum(x, 0.0)
    return x


# ---------------- deterministic parameter construction ----------------

def init_params(key, input_size, layers_sizes, output_size, skipconnections):
    params = []
    sizes_in = [input_size] + list(layers_sizes)
    sizes_out = list(layers_sizes) + [output_size]
    for din, dout in zip(sizes_in, sizes_out):
        key, kw, kb, kws, kbs = jax.random.split(key, 5)
        bound = 1.0 / jnp.sqrt(din)
        p = {
            "w": jax.random.uniform(kw, (din, dout), jnp.float32, -bound, bound),
            "b": jax.random.uniform(kb, (dout,), jnp.float32, -bound, bound),
        }
        if skipconnections and din == dout:
            p["ws"] = jax.random.uniform(kws, (dout, dout), jnp.float32, -bound, bound)
            p["bs"] = jax.random.uniform(kbs, (dout,), jnp.float32, -bound, bound)
        params.append(p)
    return params


if __name__ == "__main__":
    key = jax.random.PRNGKey(0)
    input_size, layers_sizes, output_size = 32, [32, 32], 16
    layernorm, skipconnections = True, True
    batch = 16

    kx, kp = jax.random.split(key)
    x = jax.random.normal(kx, (batch, input_size), jnp.float32)
    params = init_params(kp, input_size, layers_sizes, output_size, skipconnections)

    # One-time prep (weight padding/stacking hoisted out of the hot path).
    w_all, b_all, layer_cfgs, D = prepare_mlp(
        params, input_size=input_size, layers_sizes=layers_sizes,
        output_size=output_size, layernorm=layernorm,
        skipconnections=skipconnections)
    w_all = jax.device_put(w_all)
    b_all = jax.device_put(b_all)
    forward = build_mlp_forward(layer_cfgs, D, output_size)

    out = forward(x, w_all, b_all)
    out = jax.block_until_ready(out)

    ref = mlp_forward_ref(x, params, layernorm=layernorm,
                          skipconnections=skipconnections)
    assert out.shape == (batch, output_size)
    assert jnp.allclose(out, ref, atol=1e-4, rtol=1e-4), "mismatch vs reference"
    print("KERNEL_OK")
</pallas_src>

<mosaic_0001>
module attributes {stable_mosaic.version = 11 : i64} {
  func.func @fused_mlp_kernel(%arg0: i32, %arg1: memref<16x32xf32, #tpu.memory_space<vmem>>, %arg2: memref<5x32x32xf32, #tpu.memory_space<vmem>>, %arg3: memref<5x1x32xf32, #tpu.memory_space<vmem>>, %arg4: memref<16x32xf32, #tpu.memory_space<vmem>>) attributes {dimension_semantics = [#tpu.dimension_semantics<parallel>], iteration_bounds = array<i64: 1>, scalar_prefetch = 0 : i64, scratch_operands = 0 : i64, tpu.core_type = #tpu.core_type<tc>, window_params = [{transform_indices = @transform_0, window_bounds = array<i64: 16, 32>}, {pipeline_mode = #tpu.pipeline_mode<synchronous>, transform_indices = @transform_1, window_bounds = array<i64: 5, 32, 32>}, {pipeline_mode = #tpu.pipeline_mode<synchronous>, transform_indices = @transform_2, window_bounds = array<i64: 5, 1, 32>}, {transform_indices = @transform_3, window_bounds = array<i64: 16, 32>}]} {
    %c0 = arith.constant 0 : index
    %c0_0 = arith.constant 0 : index
    %0 = vector.load %arg1[%c0, %c0_0] : memref<16x32xf32, #tpu.memory_space<vmem>>, vector<16x32xf32>
    %c0_1 = arith.constant 0 : index
    %c0_2 = arith.constant 0 : index
    %c0_3 = arith.constant 0 : index
    %1 = vector.load %arg2[%c0_1, %c0_2, %c0_3] : memref<5x32x32xf32, #tpu.memory_space<vmem>>, vector<1x32x32xf32>
    %2 = vector.shape_cast %1 : vector<1x32x32xf32> to vector<32x32xf32>
    %cst = arith.constant dense<0.000000e+00> : vector<16x32xf32>
    %3 = tpu.matmul %0, %2, %cst {dimension_numbers = #tpu.dot_dimension_numbers<[1], [0], [0], [1], [0, 0, 1, 1], [], []>} : vector<16x32xf32>, vector<32x32xf32>, vector<16x32xf32> -> vector<16x32xf32>
    %c0_4 = arith.constant 0 : index
    %c0_5 = arith.constant 0 : index
    %c0_6 = arith.constant 0 : index
    %4 = vector.load %arg3[%c0_4, %c0_5, %c0_6] : memref<5x1x32xf32, #tpu.memory_space<vmem>>, vector<1x1x32xf32>
    %5 = vector.shape_cast %4 : vector<1x1x32xf32> to vector<1x32xf32>
    %6 = vector.broadcast %5 : vector<1x32xf32> to vector<16x32xf32>
    %7 = arith.addf %3, %6 : vector<16x32xf32>
    %cst_7 = arith.constant dense<0.000000e+00> : vector<16xf32>
    %8 = vector.multi_reduction <add>, %7, %cst_7 [1] : vector<16x32xf32> to vector<16xf32>
    %9 = vector.shape_cast %8 : vector<16xf32> to vector<16x1xf32>
    %10 = arith.mulf %7, %7 : vector<16x32xf32>
    %cst_8 = arith.constant dense<0.000000e+00> : vector<16xf32>
    %11 = vector.multi_reduction <add>, %10, %cst_8 [1] : vector<16x32xf32> to vector<16xf32>
    %12 = vector.shape_cast %11 : vector<16xf32> to vector<16x1xf32>
    %cst_9 = arith.constant 3.125000e-02 : f32
    %13 = vector.broadcast %cst_9 : f32 to vector<16x1xf32>
    %14 = arith.mulf %9, %13 : vector<16x1xf32>
    %cst_10 = arith.constant 3.125000e-02 : f32
    %15 = vector.broadcast %cst_10 : f32 to vector<16x1xf32>
    %16 = arith.mulf %12, %15 : vector<16x1xf32>
    %17 = arith.mulf %14, %14 : vector<16x1xf32>
    %18 = arith.subf %16, %17 : vector<16x1xf32>
    %cst_11 = arith.constant 0.000000e+00 : f32
    %19 = vector.broadcast %cst_11 : f32 to vector<16x1xf32>
    %20 = arith.maximumf %18, %19 : vector<16x1xf32>
    %21 = vector.broadcast %14 : vector<16x1xf32> to vector<16x32xf32>
    %22 = arith.subf %7, %21 : vector<16x32xf32>
    %cst_12 = arith.constant 9.99999974E-6 : f32
    %23 = vector.broadcast %cst_12 : f32 to vector<16x1xf32>
    %24 = arith.addf %20, %23 : vector<16x1xf32>
    %25 = math.rsqrt %24 : vector<16x1xf32>
    %26 = vector.broadcast %25 : vector<16x1xf32> to vector<16x32xf32>
    %27 = arith.mulf %22, %26 : vector<16x32xf32>
    %cst_13 = arith.constant 0.000000e+00 : f32
    %28 = vector.broadcast %cst_13 : f32 to vector<16x32xf32>
    %29 = arith.maximumf %27, %28 : vector<16x32xf32>
    %c1 = arith.constant 1 : index
    %c0_14 = arith.constant 0 : index
    %c0_15 = arith.constant 0 : index
    %30 = vector.load %arg2[%c1, %c0_14, %c0_15] : memref<5x32x32xf32, #tpu.memory_space<vmem>>, vector<1x32x32xf32>
    %31 = vector.shape_cast %30 : vector<1x32x32xf32> to vector<32x32xf32>
    %cst_16 = arith.constant dense<0.000000e+00> : vector<16x32xf32>
    %32 = tpu.matmul %29, %31, %cst_16 {dimension_numbers = #tpu.dot_dimension_numbers<[1], [0], [0], [1], [0, 0, 1, 1], [], []>} : vector<16x32xf32>, vector<32x32xf32>, vector<16x32xf32> -> vector<16x32xf32>
    %c1_17 = arith.constant 1 : index
    %c0_18 = arith.constant 0 : index
    %c0_19 = arith.constant 0 : index
    %33 = vector.load %arg3[%c1_17, %c0_18, %c0_19] : memref<5x1x32xf32, #tpu.memory_space<vmem>>, vector<1x1x32xf32>
    %34 = vector.shape_cast %33 : vector<1x1x32xf32> to vector<1x32xf32>
    %35 = vector.broadcast %34 : vector<1x32xf32> to vector<16x32xf32>
    %36 = arith.addf %32, %35 : vector<16x32xf32>
    %cst_20 = arith.constant dense<0.000000e+00> : vector<16xf32>
    %37 = vector.multi_reduction <add>, %36, %cst_20 [1] : vector<16x32xf32> to vector<16xf32>
    %38 = vector.shape_cast %37 : vector<16xf32> to vector<16x1xf32>
    %39 = arith.mulf %36, %36 : vector<16x32xf32>
    %cst_21 = arith.constant dense<0.000000e+00> : vector<16xf32>
    %40 = vector.multi_reduction <add>, %39, %cst_21 [1] : vector<16x32xf32> to vector<16xf32>
    %41 = vector.shape_cast %40 : vector<16xf32> to vector<16x1xf32>
    %cst_22 = arith.constant 3.125000e-02 : f32
    %42 = vector.broadcast %cst_22 : f32 to vector<16x1xf32>
    %43 = arith.mulf %38, %42 : vector<16x1xf32>
    %cst_23 = arith.constant 3.125000e-02 : f32
    %44 = vector.broadcast %cst_23 : f32 to vector<16x1xf32>
    %45 = arith.mulf %41, %44 : vector<16x1xf32>
    %46 = arith.mulf %43, %43 : vector<16x1xf32>
    %47 = arith.subf %45, %46 : vector<16x1xf32>
    %cst_24 = arith.constant 0.000000e+00 : f32
    %48 = vector.broadcast %cst_24 : f32 to vector<16x1xf32>
    %49 = arith.maximumf %47, %48 : vector<16x1xf32>
    %50 = vector.broadcast %43 : vector<16x1xf32> to vector<16x32xf32>
    %51 = arith.subf %36, %50 : vector<16x32xf32>
    %cst_25 = arith.constant 9.99999974E-6 : f32
    %52 = vector.broadcast %cst_25 : f32 to vector<16x1xf32>
    %53 = arith.addf %49, %52 : vector<16x1xf32>
    %54 = math.rsqrt %53 : vector<16x1xf32>
    %55 = vector.broadcast %54 : vector<16x1xf32> to vector<16x32xf32>
    %56 = arith.mulf %51, %55 : vector<16x32xf32>
    %57 = arith.addf %56, %0 : vector<16x32xf32>
    %cst_26 = arith.constant 0.000000e+00 : f32
    %58 = vector.broadcast %cst_26 : f32 to vector<16x32xf32>
    %59 = arith.maximumf %57, %58 : vector<16x32xf32>
    %c2 = arith.constant 2 : index
    %c0_27 = arith.constant 0 : index
    %c0_28 = arith.constant 0 : index
    %60 = vector.load %arg2[%c2, %c0_27, %c0_28] : memref<5x32x32xf32, #tpu.memory_space<vmem>>, vector<1x32x32xf32>
    %61 = vector.shape_cast %60 : vector<1x32x32xf32> to vector<32x32xf32>
    %cst_29 = arith.constant dense<0.000000e+00> : vector<16x32xf32>
    %62 = tpu.matmul %59, %61, %cst_29 {dimension_numbers = #tpu.dot_dimension_numbers<[1], [0], [0], [1], [0, 0, 1, 1], [], []>} : vector<16x32xf32>, vector<32x32xf32>, vector<16x32xf32> -> vector<16x32xf32>
    %c2_30 = arith.constant 2 : index
    %c0_31 = arith.constant 0 : index
    %c0_32 = arith.constant 0 : index
    %63 = vector.load %arg3[%c2_30, %c0_31, %c0_32] : memref<5x1x32xf32, #tpu.memory_space<vmem>>, vector<1x1x32xf32>
    %64 = vector.shape_cast %63 : vector<1x1x32xf32> to vector<1x32xf32>
    %65 = vector.broadcast %64 : vector<1x32xf32> to vector<16x32xf32>
    %66 = arith.addf %62, %65 : vector<16x32xf32>
    %cst_33 = arith.constant dense<0.000000e+00> : vector<16xf32>
    %67 = vector.multi_reduction <add>, %66, %cst_33 [1] : vector<16x32xf32> to vector<16xf32>
    %68 = vector.shape_cast %67 : vector<16xf32> to vector<16x1xf32>
    %69 = arith.mulf %66, %66 : vector<16x32xf32>
    %cst_34 = arith.constant dense<0.000000e+00> : vector<16xf32>
    %70 = vector.multi_reduction <add>, %69, %cst_34 [1] : vector<16x32xf32> to vector<16xf32>
    %71 = vector.shape_cast %70 : vector<16xf32> to vector<16x1xf32>
    %cst_35 = arith.constant 3.125000e-02 : f32
    %72 = vector.broadcast %cst_35 : f32 to vector<16x1xf32>
    %73 = arith.mulf %68, %72 : vector<16x1xf32>
    %cst_36 = arith.constant 3.125000e-02 : f32
    %74 = vector.broadcast %cst_36 : f32 to vector<16x1xf32>
    %75 = arith.mulf %71, %74 : vector<16x1xf32>
    %76 = arith.mulf %73, %73 : vector<16x1xf32>
    %77 = arith.subf %75, %76 : vector<16x1xf32>
    %cst_37 = arith.constant 0.000000e+00 : f32
    %78 = vector.broadcast %cst_37 : f32 to vector<16x1xf32>
    %79 = arith.maximumf %77, %78 : vector<16x1xf32>
    %80 = vector.broadcast %73 : vector<16x1xf32> to vector<16x32xf32>
    %81 = arith.subf %66, %80 : vector<16x32xf32>
    %cst_38 = arith.constant 9.99999974E-6 : f32
    %82 = vector.broadcast %cst_38 : f32 to vector<16x1xf32>
    %83 = arith.addf %79, %82 : vector<16x1xf32>
    %84 = math.rsqrt %83 : vector<16x1xf32>
    %85 = vector.broadcast %84 : vector<16x1xf32> to vector<16x32xf32>
    %86 = arith.mulf %81, %85 : vector<16x32xf32>
    %cst_39 = arith.constant 0.000000e+00 : f32
    %87 = vector.broadcast %cst_39 : f32 to vector<16x32xf32>
    %88 = arith.maximumf %86, %87 : vector<16x32xf32>
    %c3 = arith.constant 3 : index
    %c0_40 = arith.constant 0 : index
    %c0_41 = arith.constant 0 : index
    %89 = vector.load %arg2[%c3, %c0_40, %c0_41] : memref<5x32x32xf32, #tpu.memory_space<vmem>>, vector<1x32x32xf32>
    %90 = vector.shape_cast %89 : vector<1x32x32xf32> to vector<32x32xf32>
    %cst_42 = arith.constant dense<0.000000e+00> : vector<16x32xf32>
    %91 = tpu.matmul %88, %90, %cst_42 {dimension_numbers = #tpu.dot_dimension_numbers<[1], [0], [0], [1], [0, 0, 1, 1], [], []>} : vector<16x32xf32>, vector<32x32xf32>, vector<16x32xf32> -> vector<16x32xf32>
    %c3_43 = arith.constant 3 : index
    %c0_44 = arith.constant 0 : index
    %c0_45 = arith.constant 0 : index
    %92 = vector.load %arg3[%c3_43, %c0_44, %c0_45] : memref<5x1x32xf32, #tpu.memory_space<vmem>>, vector<1x1x32xf32>
    %93 = vector.shape_cast %92 : vector<1x1x32xf32> to vector<1x32xf32>
    %94 = vector.broadcast %93 : vector<1x32xf32> to vector<16x32xf32>
    %95 = arith.addf %91, %94 : vector<16x32xf32>
    %cst_46 = arith.constant dense<0.000000e+00> : vector<16xf32>
    %96 = vector.multi_reduction <add>, %95, %cst_46 [1] : vector<16x32xf32> to vector<16xf32>
    %97 = vector.shape_cast %96 : vector<16xf32> to vector<16x1xf32>
    %98 = arith.mulf %95, %95 : vector<16x32xf32>
    %cst_47 = arith.constant dense<0.000000e+00> : vector<16xf32>
    %99 = vector.multi_reduction <add>, %98, %cst_47 [1] : vector<16x32xf32> to vector<16xf32>
    %100 = vector.shape_cast %99 : vector<16xf32> to vector<16x1xf32>
    %cst_48 = arith.constant 3.125000e-02 : f32
    %101 = vector.broadcast %cst_48 : f32 to vector<16x1xf32>
    %102 = arith.mulf %97, %101 : vector<16x1xf32>
    %cst_49 = arith.constant 3.125000e-02 : f32
    %103 = vector.broadcast %cst_49 : f32 to vector<16x1xf32>
    %104 = arith.mulf %100, %103 : vector<16x1xf32>
    %105 = arith.mulf %102, %102 : vector<16x1xf32>
    %106 = arith.subf %104, %105 : vector<16x1xf32>
    %cst_50 = arith.constant 0.000000e+00 : f32
    %107 = vector.broadcast %cst_50 : f32 to vector<16x1xf32>
    %108 = arith.maximumf %106, %107 : vector<16x1xf32>
    %109 = vector.broadcast %102 : vector<16x1xf32> to vector<16x32xf32>
    %110 = arith.subf %95, %109 : vector<16x32xf32>
    %cst_51 = arith.constant 9.99999974E-6 : f32
    %111 = vector.broadcast %cst_51 : f32 to vector<16x1xf32>
    %112 = arith.addf %108, %111 : vector<16x1xf32>
    %113 = math.rsqrt %112 : vector<16x1xf32>
    %114 = vector.broadcast %113 : vector<16x1xf32> to vector<16x32xf32>
    %115 = arith.mulf %110, %114 : vector<16x32xf32>
    %116 = arith.addf %115, %59 : vector<16x32xf32>
    %cst_52 = arith.constant 0.000000e+00 : f32
    %117 = vector.broadcast %cst_52 : f32 to vector<16x32xf32>
    %118 = arith.maximumf %116, %117 : vector<16x32xf32>
    %c4 = arith.constant 4 : index
    %c0_53 = arith.constant 0 : index
    %c0_54 = arith.constant 0 : index
    %119 = vector.load %arg2[%c4, %c0_53, %c0_54] : memref<5x32x32xf32, #tpu.memory_space<vmem>>, vector<1x32x32xf32>
    %120 = vector.shape_cast %119 : vector<1x32x32xf32> to vector<32x32xf32>
    %cst_55 = arith.constant dense<0.000000e+00> : vector<16x32xf32>
    %121 = tpu.matmul %118, %120, %cst_55 {dimension_numbers = #tpu.dot_dimension_numbers<[1], [0], [0], [1], [0, 0, 1, 1], [], []>} : vector<16x32xf32>, vector<32x32xf32>, vector<16x32xf32> -> vector<16x32xf32>
    %c4_56 = arith.constant 4 : index
    %c0_57 = arith.constant 0 : index
    %c0_58 = arith.constant 0 : index
    %122 = vector.load %arg3[%c4_56, %c0_57, %c0_58] : memref<5x1x32xf32, #tpu.memory_space<vmem>>, vector<1x1x32xf32>
    %123 = vector.shape_cast %122 : vector<1x1x32xf32> to vector<1x32xf32>
    %124 = vector.broadcast %123 : vector<1x32xf32> to vector<16x32xf32>
    %125 = arith.addf %121, %124 : vector<16x32xf32>
    %cst_59 = arith.constant dense<0.000000e+00> : vector<16xf32>
    %126 = vector.multi_reduction <add>, %125, %cst_59 [1] : vector<16x32xf32> to vector<16xf32>
    %127 = vector.shape_cast %126 : vector<16xf32> to vector<16x1xf32>
    %128 = arith.mulf %125, %125 : vector<16x32xf32>
    %cst_60 = arith.constant dense<0.000000e+00> : vector<16xf32>
    %129 = vector.multi_reduction <add>, %128, %cst_60 [1] : vector<16x32xf32> to vector<16xf32>
    %130 = vector.shape_cast %129 : vector<16xf32> to vector<16x1xf32>
    %cst_61 = arith.constant 6.250000e-02 : f32
    %131 = vector.broadcast %cst_61 : f32 to vector<16x1xf32>
    %132 = arith.mulf %127, %131 : vector<16x1xf32>
    %cst_62 = arith.constant 6.250000e-02 : f32
    %133 = vector.broadcast %cst_62 : f32 to vector<16x1xf32>
    %134 = arith.mulf %130, %133 : vector<16x1xf32>
    %135 = arith.mulf %132, %132 : vector<16x1xf32>
    %136 = arith.subf %134, %135 : vector<16x1xf32>
    %cst_63 = arith.constant 0.000000e+00 : f32
    %137 = vector.broadcast %cst_63 : f32 to vector<16x1xf32>
    %138 = arith.maximumf %136, %137 : vector<16x1xf32>
    %139 = vector.broadcast %132 : vector<16x1xf32> to vector<16x32xf32>
    %140 = arith.subf %125, %139 : vector<16x32xf32>
    %cst_64 = arith.constant 9.99999974E-6 : f32
    %141 = vector.broadcast %cst_64 : f32 to vector<16x1xf32>
    %142 = arith.addf %138, %141 : vector<16x1xf32>
    %143 = math.rsqrt %142 : vector<16x1xf32>
    %144 = vector.broadcast %143 : vector<16x1xf32> to vector<16x32xf32>
    %145 = arith.mulf %140, %144 : vector<16x32xf32>
    %c0_65 = arith.constant 0 : index
    %c0_66 = arith.constant 0 : index
    %146 = vector.load %arg4[%c0_65, %c0_66] : memref<16x32xf32, #tpu.memory_space<vmem>>, vector<16x32xf32>
    tpu.vector_store %arg4[%c0_65, %c0_66], %145 {strides = array<i32>} : memref<16x32xf32, #tpu.memory_space<vmem>>, vector<16x32xf32>,
    return
  }
  func.func @transform_0(%arg0: i32) -> (i32, i32) {
    %c0_i32 = arith.constant 0 : i32
    %c0_i32_0 = arith.constant 0 : i32
    return %arg0, %c0_i32 : i32, i32
  }
  func.func @transform_1(%arg0: i32) -> (i32, i32, i32) {
    %c0_i32 = arith.constant 0 : i32
    %c0_i32_0 = arith.constant 0 : i32
    %c0_i32_1 = arith.constant 0 : i32
    %c0_i32_2 = arith.constant 0 : i32
    return %c0_i32, %c0_i32_0, %c0_i32_1 : i32, i32, i32
  }
  func.func @transform_2(%arg0: i32) -> (i32, i32, i32) {
    %c0_i32 = arith.constant 0 : i32
    %c0_i32_0 = arith.constant 0 : i32
    %c0_i32_1 = arith.constant 0 : i32
    %c0_i32_2 = arith.constant 0 : i32
    return %c0_i32, %c0_i32_0, %c0_i32_1 : i32, i32, i32
  }
  func.func @transform_3(%arg0: i32) -> (i32, i32) {
    %c0_i32 = arith.constant 0 : i32
    %c0_i32_0 = arith.constant 0 : i32
    return %arg0, %c0_i32 : i32, i32
  }
}

</mosaic_0001>

<bundles_post_ra>
// kernel: forward.1
= control target key start
LH: loop header
LB: loop body
LE: loop exit
PB: predicated region body
PF: predicated region fallthrough
CT: control target
= control target key end

     0   :  { %8 = vsyncpa [#allocation3], 0  ;;  %s1086_s0 = inlined_call_operand.hbm [shape: f32[16,32], index: 0, kind: input, shape index: {}]   ;;  %s1087_s1 = inlined_call_operand.hbm [shape: f32[5,32,32], index: 1, kind: input, shape index: {}]   ;;  %s1088_s2 = inlined_call_operand.vmem [shape: f32[5,1,32], index: 2, kind: input, shape index: {}]   ;;  %s1089_s3 = inlined_call_operand.hbm [shape: f32[16,32], index: 3, kind: output, shape index: {}]  }
   0x1   :  { %9 = vsyncpa [#allocation6], 0 }
   0x2   :  { %10 = vsyncpa [#allocation4], 0  ;;  %s947_s12 = smov [#allocation2]   ;;  %s875_s16 = scalar_lea.hbm %s1086_s0, 256 }
   0x3   :  { %s16_s13 = sshll.u32 %s947_s12, 4  ;;  %p876_p0 = scmp.ne.s32.totalorder %s1086_s0, %s875_s16  ;;  %s17_s13 = int_to_ptr.vmem [resolvable:$true] %s16_s13 }
   0x4   :  { %p879_p1 = scmp.lt.u32.totalorder %s875_s16, %s1086_s0 }
   0x6   :  { %p881_p2 = pnand %p879_p1, %p876_p0 }
   0x8   :  { %884 = shalt.err (!%p881_p2)
}
   0x9   :  { %s885_s21 = scalar_lea.vmem %s17_s13, 256  ;;  %p890_p4 = scmp.lt.s32.totalorder %s17_s13, %s17_s13 }
   0xa   :  { %p886_p3 = scmp.ne.s32.totalorder %s17_s13, %s885_s21  ;;  %p891_p5 = scmp.lt.s32.totalorder %s885_s21, %s885_s21 }
   0xc   :  { %p892_p6 = por %p891_p5, %p890_p4 }
   0xe   :  { %p893_p7 = pnand %p892_p6, %p886_p3 }
  0x10   :  { %896 = shalt.err (!%p893_p7)
}
  0x11   :  { %s948_s22 = smov 128   ;;  %s949_s23 = smov 8  }
  0x12   :  { %22 = dma.hbm_to_vmem [thread:$0]  %s1086_s0, 256, %s17_s13, [#allocation3], %s948_s22, %s948_s22, %s949_s23  }
  0x13   :  { %s950_s26 = smov [#allocation5]   ;;  %s897_s30 = scalar_lea.hbm %s1087_s1, 2560 }
  0x14   :  { %s28_s27 = sshll.u32 %s950_s26, 4  ;;  %p898_p8 = scmp.ne.s32.totalorder %s1087_s1, %s897_s30  ;;  %s29_s27 = int_to_ptr.vmem [resolvable:$true] %s28_s27 }
  0x15   :  { %p901_p9 = scmp.lt.u32.totalorder %s897_s30, %s1087_s1 }
  0x17   :  { %p903_p10 = pnand %p901_p9, %p898_p8 }
  0x19   :  { %906 = shalt.err (!%p903_p10)
}
  0x1a   :  { %s907_s8 = scalar_lea.vmem %s29_s27, 2560  ;;  %p912_p12 = scmp.lt.s32.totalorder %s29_s27, %s29_s27 }
  0x1b   :  { %p908_p11 = scmp.ne.s32.totalorder %s29_s27, %s907_s8  ;;  %p913_p13 = scmp.lt.s32.totalorder %s907_s8, %s907_s8 }
  0x1d   :  { %p914_p0 = por %p913_p13, %p912_p12 }
  0x1f   :  { %p915_p1 = pnand %p914_p0, %p908_p11 }
  0x21   :  { %918 = shalt.err (!%p915_p1)
}
  0x22   :  { %34 = dma.hbm_to_vmem [thread:$0]  %s1087_s1, 2560, %s29_s27, [#allocation6], %s948_s22, %s948_s22, %s949_s23  }
  0x23   :  { %941 = dma.done.wait [#allocation3], 256  }
  0x24   :  { %942 = vsyncadd [#allocation3], 4294967040 }
  0x25   :  { %943 = dma.done.wait [#allocation6], 2560  }
  0x26   :  { %944 = vsyncadd [#allocation6], 4294964736  ;;  %vm56_vm0 = vcmask 261120   ;;  %v45_v0 = vld [vmem:[#allocation5] sm:$0xff]  ;;  %v46_v1 = vld [vmem:[#allocation5 + $0x8] sm:$0xff] }
  0x27   :  { %v47_v2 = vld [vmem:[#allocation5 + $0x10] sm:$0xff]  ;;  %v810_v3 = vpack.c.bf16 %v46_v1, %v45_v0  ;;  %v48_v4 = vld [vmem:[#allocation5 + $0x18] sm:$0xff]  ;;  %v173_v19 = vld [vmem:[#allocation5 + $0x20] sm:$0xff] }
  0x28   :  { %v1002_v5 = vld [vmem:[#allocation2] sm:$0xff]  ;;  %v814_v6 = vpack.c.bf16 %v48_v4, %v47_v2  ;;  %v1006_v7 = vld [vmem:[#allocation2 + $0x8] sm:$0xff]  ;;  %v174_v20 = vld [vmem:[#allocation5 + $0x28] sm:$0xff] }
  0x29   :  { %763 = vmatprep.mubr.msk.f32.mxu0 %vm56_vm0, %v1002_v5  ;;  %811 = vmatprep.subr.bf16.mxu0 %v810_v3  ;;  %v706_v8 = vld [vmem:[%s1088_s2] ss:$0 sm:$0xff]  ;;  %v818_v22 = vpack.c.bf16 %v174_v20, %v173_v19  ;;  %v176_v23 = vld [vmem:[#allocation5 + $0x38] sm:$0xff]  ;;  %v710_v49 = vld [vmem:[%s1088_s2 + $0x1] ss:$0 sm:$0xff] }
  0x2a   :  { %813 = vmatpush3.bf16.msra.mxu0 %v810_v3  ;;  %v175_v21 = vld [vmem:[#allocation5 + $0x30] sm:$0xff]  ;;  %v303_v60 = vld [vmem:[#allocation5 + $0x40] sm:$0xff]  ;;  %v304_v61 = vld [vmem:[#allocation5 + $0x48] sm:$0xff] }
  0x2b   :  { %815 = vmatprep.subr.bf16.mxu0 %v814_v6  ;;  %v822_v24 = vpack.c.bf16 %v176_v23, %v175_v21  ;;  %819 = vmatprep.subr.bf16.mxu1 %v818_v22  ;;  %v305_v62 = vld [vmem:[#allocation5 + $0x50] sm:$0xff]  ;;  %v826_v63 = vpack.c.bf16 %v304_v61, %v303_v60  ;;  %v306_v0 = vld [vmem:[#allocation5 + $0x58] sm:$0xff] }
  0x2c   :  { %821 = vmatpush3.bf16.msra.mxu1 %v818_v22  ;;  %v830_v1 = vpack.c.bf16 %v306_v0, %v305_v62 }
  0x2d   :  { %823 = vmatprep.subr.bf16.mxu1 %v822_v24 }
  0x2e   :  { %817 = vmatpush3.bf16.msra.mxu0 %v814_v6 }
  0x2f   :  { %827 = vmatprep.subr.bf16.mxu0 %v826_v63 }
  0x30   :  { %825 = vmatpush3.bf16.msra.mxu1 %v822_v24 }
  0x31   :  { %764 = vmatmul.mubr.msk.f32.vlgmr.msra.gmra.mrb[0].mxu0 %vm56_vm0, %v1006_v7 }
  0x32   :  { %829 = vmatpush3.bf16.msra.mxu0 %v826_v63 }
  0x33   :  { %831 = vmatprep.subr.bf16.mxu0 %v830_v1 }
  0x36   :  { %833 = vmatpush3.bf16.msra.mxu0 %v830_v1 }
 0x104   :  { %v765_v9 = vpop.f32.mrb[0].mxu0 }
 0x105   :  { %v129_v10 = vpop.f32.mrb[1].mxu0  ;;  %v135_v11 = vadd.f32 %v765_v9, %v706_v8 }
 0x106   :  { %v130_v12 = vadd.f32 %v706_v8, %v129_v10 }
 0x107   :  { %v145_v16 = vmul.f32 %v135_v11, %v135_v11  ;;  %v141_v17 = vsel %vm56_vm0, %v135_v11, 0.0 }
 0x108   :  { %v138_v13 = vsel %vm56_vm0, %v130_v12, 0.0  ;;  %v144_v14 = vmul.f32 %v130_v12, %v130_v12 }
 0x109   :  { %139 = vadd.xlane.f32.xlu0 %v138_v13  ;;  %v149_v18 = vsel %vm56_vm0, %v145_v16, 0.0 }
 0x10a   :  { %v146_v15 = vsel %vm56_vm0, %v144_v14, 0.0 }
 0x10b   :  { %147 = vadd.xlane.f32.xlu1 %v146_v15 }
 0x10d   :  { %142 = vadd.xlane.f32.xlu0 %v141_v17 }
 0x10f   :  { %150 = vadd.xlane.f32.xlu1 %v149_v18 }
 0x196   :  { %v140_v25 = vpop.xlane.xlu0 %139 }
 0x197   :  { %v152_v26 = vmul.f32 0.03125, %v140_v25 }
 0x198   :  { %v148_v27 = vpop.xlane.xlu1 %147 }
 0x199   :  { %v156_v28 = vmul.f32 %v152_v26, %v152_v26  ;;  %v154_v29 = vmul.f32 0.03125, %v148_v27  ;;  %v162_v41 = vsub.f32 %v130_v12, %v152_v26 }
 0x19a   :  { %v143_v30 = vpop.xlane.xlu0 %142 }
 0x19b   :  { %v158_v31 = vsub.f32 %v154_v29, %v156_v28  ;;  %v153_v32 = vmul.f32 0.03125, %v143_v30 }
 0x19c   :  { %v151_v33 = vpop.xlane.xlu1 %150 }
 0x19d   :  { %v160_v34 = vmax.f32 %v158_v31, 0.0  ;;  %v157_v35 = vmul.f32 %v153_v32, %v153_v32  ;;  %v155_v36 = vmul.f32 0.03125, %v151_v33  ;;  %v163_v44 = vsub.f32 %v135_v11, %v153_v32 }
 0x19f   :  { %v164_v37 = vadd.f32 1e-05, %v160_v34  ;;  %v159_v38 = vsub.f32 %v155_v36, %v157_v35 }
 0x1a1   :  { %855 = vrsqrt.f32 %v164_v37  ;;  %v161_v39 = vmax.f32 %v159_v38, 0.0 }
 0x1a3   :  { %v165_v40 = vadd.f32 1e-05, %v161_v39  ;;  %v431_v39 = vld [vmem:[#allocation5 + $0x60] sm:$0xff] }
 0x1a5   :  { %857 = vrsqrt.f32 %v165_v40  ;;  %v432_v40 = vld [vmem:[#allocation5 + $0x68] sm:$0xff] }
 0x1ab   :  { %v856_v42 = vpop.eup %855 }
 0x1ac   :  { %v168_v43 = vmul.f32 %v856_v42, %v162_v41  ;;  %v433_v41 = vld [vmem:[#allocation5 + $0x70] sm:$0xff]  ;;  %v834_v42 = vpack.c.bf16 %v432_v40, %v431_v39 }
 0x1ae   :  { %v170_v45 = vmax.f32 %v168_v43, 0.0  ;;  %v434_v43 = vld [vmem:[#allocation5 + $0x78] sm:$0xff]  ;;  %835 = vmatprep.subr.bf16.mxu1 %v834_v42 }
 0x1af   :  { %v858_v46 = vpop.eup %857 }
 0x1b0   :  { %774 = vmatprep.mubr.msk.f32.mxu1 %vm56_vm0, %v170_v45  ;;  %v169_v47 = vmul.f32 %v858_v46, %v163_v44  ;;  %v838_v44 = vpack.c.bf16 %v434_v43, %v433_v41 }
 0x1b2   :  { %v171_v48 = vmax.f32 %v169_v47, 0.0 }
 0x1b4   :  { %775 = vmatmul.mubr.msk.f32.vlgmr.msra.gmra.mrb[0].mxu1 %vm56_vm0, %v171_v48 }
 0x1b5   :  { %837 = vmatpush3.bf16.msra.mxu1 %v834_v42 }
 0x1b6   :  { %839 = vmatprep.subr.bf16.mxu1 %v838_v44 }
 0x1b9   :  { %841 = vmatpush3.bf16.msra.mxu1 %v838_v44 }
 0x287   :  { %v776_v50 = vpop.f32.mrb[0].mxu1 }
 0x288   :  { %v263_v51 = vadd.f32 %v776_v50, %v710_v49  ;;  %v257_v52 = vpop.f32.mrb[1].mxu1 }
 0x289   :  { %v258_v53 = vadd.f32 %v710_v49, %v257_v52 }
 0x28a   :  { %v269_v54 = vsel %vm56_vm0, %v263_v51, 0.0  ;;  %v273_v55 = vmul.f32 %v263_v51, %v263_v51 }
 0x28b   :  { %270 = vadd.xlane.f32.xlu1 %v269_v54  ;;  %v266_v56 = vsel %vm56_vm0, %v258_v53, 0.0  ;;  %v272_v57 = vmul.f32 %v258_v53, %v258_v53 }
 0x28c   :  { %267 = vadd.xlane.f32.xlu0 %v266_v56  ;;  %v277_v58 = vsel %vm56_vm0, %v273_v55, 0.0 }
 0x28d   :  { %v274_v59 = vsel %vm56_vm0, %v272_v57, 0.0 }
 0x28f   :  { %278 = vadd.xlane.f32.xlu1 %v277_v58 }
 0x290   :  { %275 = vadd.xlane.f32.xlu0 %v274_v59 }
 0x318   :  { %v271_v2 = vpop.xlane.xlu1 %270 }
 0x319   :  { %v281_v3 = vmul.f32 0.03125, %v271_v2  ;;  %v268_v4 = vpop.xlane.xlu0 %267 }
 0x31a   :  { %v280_v6 = vmul.f32 0.03125, %v268_v4 }
 0x31b   :  { %v285_v9 = vmul.f32 %v281_v3, %v281_v3  ;;  %v291_v20 = vsub.f32 %v263_v51, %v281_v3 }
 0x31c   :  { %v279_v8 = vpop.xlane.xlu1 %278  ;;  %v284_v12 = vmul.f32 %v280_v6, %v280_v6  ;;  %v290_v22 = vsub.f32 %v258_v53, %v280_v6  ;;  %v718_v6 = vld [vmem:[%s1088_s2 + $0x3] ss:$0 sm:$0xff] }
 0x31d   :  { %v283_v10 = vmul.f32 0.03125, %v279_v8  ;;  %v276_v11 = vpop.xlane.xlu0 %275 }
 0x31e   :  { %v282_v13 = vmul.f32 0.03125, %v276_v11 }
 0x31f   :  { %v287_v14 = vsub.f32 %v283_v10, %v285_v9 }
 0x320   :  { %v286_v15 = vsub.f32 %v282_v13, %v284_v12 }
 0x321   :  { %v289_v16 = vmax.f32 %v287_v14, 0.0 }
 0x322   :  { %v288_v17 = vmax.f32 %v286_v15, 0.0 }
 0x323   :  { %v293_v18 = vadd.f32 1e-05, %v289_v16 }
 0x324   :  { %v292_v19 = vadd.f32 1e-05, %v288_v17 }
 0x325   :  { %859 = vrsqrt.f32 %v293_v18  ;;  %v561_v18 = vld [vmem:[#allocation5 + $0x80] sm:$0xff] }
 0x326   :  { %861 = vrsqrt.f32 %v292_v19  ;;  %v562_v19 = vld [vmem:[#allocation5 + $0x88] sm:$0xff] }
 0x32f   :  { %v860_v21 = vpop.eup %859 }
 0x330   :  { %v862_v23 = vpop.eup %861  ;;  %v297_v24 = vmul.f32 %v860_v21, %v291_v20  ;;  %v563_v20 = vld [vmem:[#allocation5 + $0x90] sm:$0xff]  ;;  %v842_v21 = vpack.c.bf16 %v562_v19, %v561_v18 }
 0x331   :  { %v296_v25 = vmul.f32 %v862_v23, %v290_v22  ;;  %v564_v22 = vld [vmem:[#allocation5 + $0x98] sm:$0xff] }
 0x332   :  { %v1027_v26 = vadd.f32 %v297_v24, %v1006_v7  ;;  %v714_v7 = vld [vmem:[%s1088_s2 + $0x2] ss:$0 sm:$0xff]  ;;  %v846_v23 = vpack.c.bf16 %v564_v22, %v563_v20  ;;  %843 = vmatprep.subr.bf16.mxu0 %v842_v21 }
 0x333   :  { %v1030_v27 = vadd.f32 %v296_v25, %v1002_v5 }
 0x334   :  { %v301_v29 = vmax.f32 %v1027_v26, 0.0 }
 0x335   :  { %v300_v28 = vmax.f32 %v1030_v27, 0.0 }
 0x337   :  { %785 = vmatprep.mubr.msk.f32.mxu0 %vm56_vm0, %v300_v28 }
 0x338   :  { %786 = vmatmul.mubr.msk.f32.vlgmr.msra.gmra.mrb[2].mxu0 %vm56_vm0, %v301_v29 }
 0x339   :  { %845 = vmatpush3.bf16.msra.mxu0 %v842_v21 }
 0x33a   :  { %847 = vmatprep.subr.bf16.mxu0 %v846_v23 }
 0x33d   :  { %849 = vmatpush3.bf16.msra.mxu0 %v846_v23 }
 0x40b   :  { %v787_v30 = vpop.f32.mrb[2].mxu0 }
 0x40c   :  { %v393_v31 = vadd.f32 %v787_v30, %v714_v7  ;;  %v387_v5 = vpop.f32.mrb[3].mxu0 }
 0x40d   :  { %v388_v32 = vadd.f32 %v714_v7, %v387_v5 }
 0x40e   :  { %v399_v33 = vsel %vm56_vm0, %v393_v31, 0.0  ;;  %v403_v34 = vmul.f32 %v393_v31, %v393_v31 }
 0x40f   :  { %400 = vadd.xlane.f32.xlu1 %v399_v33  ;;  %v396_v35 = vsel %vm56_vm0, %v388_v32, 0.0  ;;  %v402_v36 = vmul.f32 %v388_v32, %v388_v32 }
 0x410   :  { %397 = vadd.xlane.f32.xlu0 %v396_v35  ;;  %v407_v37 = vsel %vm56_vm0, %v403_v34, 0.0 }
 0x411   :  { %v404_v38 = vsel %vm56_vm0, %v402_v36, 0.0 }
 0x413   :  { %408 = vadd.xlane.f32.xlu1 %v407_v37 }
 0x414   :  { %405 = vadd.xlane.f32.xlu0 %v404_v38 }
 0x49c   :  { %v401_v45 = vpop.xlane.xlu1 %400 }
 0x49d   :  { %v411_v46 = vmul.f32 0.03125, %v401_v45  ;;  %v398_v47 = vpop.xlane.xlu0 %397 }
 0x49e   :  { %v410_v48 = vmul.f32 0.03125, %v398_v47 }
 0x49f   :  { %v415_v50 = vmul.f32 %v411_v46, %v411_v46  ;;  %v421_v61 = vsub.f32 %v393_v31, %v411_v46 }
 0x4a0   :  { %v409_v49 = vpop.xlane.xlu1 %408  ;;  %v414_v53 = vmul.f32 %v410_v48, %v410_v48  ;;  %v420_v63 = vsub.f32 %v388_v32, %v410_v48 }
 0x4a1   :  { %v413_v51 = vmul.f32 0.03125, %v409_v49  ;;  %v406_v52 = vpop.xlane.xlu0 %405 }
 0x4a2   :  { %v412_v54 = vmul.f32 0.03125, %v406_v52  ;;  %v722_v52 = vld [vmem:[%s1088_s2 + $0x4] ss:$0 sm:$0xff]  ;;  %s951_s2 = smov [#allocation7]  }
 0x4a3   :  { %v417_v55 = vsub.f32 %v413_v51, %v415_v50  ;;  %s693_s19 = sshll.u32 %s951_s2, 4  ;;  %s694_s19 = int_to_ptr.vmem [resolvable:$true] %s693_s19 }
 0x4a4   :  { %v416_v56 = vsub.f32 %v412_v54, %v414_v53  ;;  %s919_s20 = scalar_lea.vmem %s694_s19, 256  ;;  %p924_p3 = scmp.lt.s32.totalorder %s694_s19, %s694_s19 }
 0x4a5   :  { %v419_v57 = vmax.f32 %v417_v55, 0.0  ;;  %p920_p2 = scmp.ne.s32.totalorder %s694_s19, %s919_s20  ;;  %p925_p4 = scmp.lt.s32.totalorder %s919_s20, %s919_s20 }
 0x4a6   :  { %v418_v58 = vmax.f32 %v416_v56, 0.0 }
 0x4a7   :  { %v423_v59 = vadd.f32 1e-05, %v419_v57  ;;  %p926_p5 = por %p925_p4, %p924_p3 }
 0x4a8   :  { %v422_v60 = vadd.f32 1e-05, %v418_v58 }
 0x4a9   :  { %863 = vrsqrt.f32 %v423_v59  ;;  %p927_p6 = pnand %p926_p5, %p920_p2 }
 0x4aa   :  { %865 = vrsqrt.f32 %v422_v60 }
 0x4b3   :  { %v864_v62 = vpop.eup %863 }
 0x4b4   :  { %v866_v0 = vpop.eup %865  ;;  %v427_v1 = vmul.f32 %v864_v62, %v421_v61 }
 0x4b5   :  { %v426_v2 = vmul.f32 %v866_v0, %v420_v63 }
 0x4b6   :  { %v429_v4 = vmax.f32 %v427_v1, 0.0 }
 0x4b7   :  { %v428_v3 = vmax.f32 %v426_v2, 0.0 }
 0x4b9   :  { %796 = vmatprep.mubr.msk.f32.mxu1 %vm56_vm0, %v428_v3 }
 0x4ba   :  { %797 = vmatmul.mubr.msk.f32.vlgmr.msra.gmra.mrb[2].mxu1 %vm56_vm0, %v429_v4 }
 0x58d   :  { %v798_v8 = vpop.f32.mrb[2].mxu1 }
 0x58e   :  { %v521_v9 = vadd.f32 %v798_v8, %v718_v6  ;;  %v515_v10 = vpop.f32.mrb[3].mxu1 }
 0x58f   :  { %v516_v11 = vadd.f32 %v718_v6, %v515_v10 }
 0x590   :  { %v527_v12 = vsel %vm56_vm0, %v521_v9, 0.0  ;;  %v531_v13 = vmul.f32 %v521_v9, %v521_v9 }
 0x591   :  { %528 = vadd.xlane.f32.xlu1 %v527_v12  ;;  %v524_v14 = vsel %vm56_vm0, %v516_v11, 0.0  ;;  %v530_v15 = vmul.f32 %v516_v11, %v516_v11 }
 0x592   :  { %525 = vadd.xlane.f32.xlu0 %v524_v14  ;;  %v535_v16 = vsel %vm56_vm0, %v531_v13, 0.0 }
 0x593   :  { %v532_v17 = vsel %vm56_vm0, %v530_v15, 0.0 }
 0x595   :  { %536 = vadd.xlane.f32.xlu1 %v535_v16 }
 0x596   :  { %533 = vadd.xlane.f32.xlu0 %v532_v17 }
 0x61e   :  { %v529_v24 = vpop.xlane.xlu1 %528 }
 0x61f   :  { %v539_v25 = vmul.f32 0.03125, %v529_v24  ;;  %v526_v7 = vpop.xlane.xlu0 %525 }
 0x620   :  { %v538_v30 = vmul.f32 0.03125, %v526_v7 }
 0x621   :  { %v543_v5 = vmul.f32 %v539_v25, %v539_v25  ;;  %v549_v42 = vsub.f32 %v521_v9, %v539_v25 }
 0x622   :  { %v537_v31 = vpop.xlane.xlu1 %536  ;;  %v542_v34 = vmul.f32 %v538_v30, %v538_v30  ;;  %v548_v44 = vsub.f32 %v516_v11, %v538_v30 }
 0x623   :  { %v541_v32 = vmul.f32 0.03125, %v537_v31  ;;  %v534_v33 = vpop.xlane.xlu0 %533 }
 0x624   :  { %v540_v35 = vmul.f32 0.03125, %v534_v33 }
 0x625   :  { %v545_v36 = vsub.f32 %v541_v32, %v543_v5 }
 0x626   :  { %v544_v37 = vsub.f32 %v540_v35, %v542_v34 }
 0x627   :  { %v547_v38 = vmax.f32 %v545_v36, 0.0 }
 0x628   :  { %v546_v39 = vmax.f32 %v544_v37, 0.0 }
 0x629   :  { %v551_v40 = vadd.f32 1e-05, %v547_v38 }
 0x62a   :  { %v550_v41 = vadd.f32 1e-05, %v546_v39 }
 0x62b   :  { %867 = vrsqrt.f32 %v551_v40 }
 0x62c   :  { %869 = vrsqrt.f32 %v550_v41 }
 0x635   :  { %v868_v43 = vpop.eup %867 }
 0x636   :  { %v870_v45 = vpop.eup %869  ;;  %v555_v46 = vmul.f32 %v868_v43, %v549_v42 }
 0x637   :  { %v554_v47 = vmul.f32 %v870_v45, %v548_v44 }
 0x638   :  { %v557_v48 = vadd.f32 %v555_v46, %v301_v29 }
 0x639   :  { %v556_v49 = vadd.f32 %v554_v47, %v300_v28 }
 0x63a   :  { %v559_v51 = vmax.f32 %v557_v48, 0.0 }
 0x63b   :  { %v558_v50 = vmax.f32 %v556_v49, 0.0 }
 0x63d   :  { %807 = vmatprep.mubr.msk.f32.mxu0 %vm56_vm0, %v558_v50 }
 0x63e   :  { %808 = vmatmul.mubr.msk.f32.vlgmr.msra.gmra.mrb[4].mxu0 %vm56_vm0, %v559_v51 }
 0x711   :  { %v809_v53 = vpop.f32.mrb[4].mxu0 }
 0x712   :  { %v651_v54 = vadd.f32 %v809_v53, %v722_v52  ;;  %v645_v55 = vpop.f32.mrb[5].mxu0 }
 0x713   :  { %v646_v56 = vadd.f32 %v722_v52, %v645_v55 }
 0x714   :  { %v657_v26 = vsel %vm56_vm0, %v651_v54, 0.0  ;;  %v661_v29 = vmul.f32 %v651_v54, %v651_v54 }
 0x715   :  { %658 = vadd.xlane.f32.xlu1 %v657_v26  ;;  %v654_v27 = vsel %vm56_vm0, %v646_v56, 0.0  ;;  %v660_v28 = vmul.f32 %v646_v56, %v646_v56 }
 0x716   :  { %655 = vadd.xlane.f32.xlu0 %v654_v27  ;;  %v665_v57 = vsel %vm56_vm0, %v661_v29, 0.0 }
 0x717   :  { %v662_v58 = vsel %vm56_vm0, %v660_v28, 0.0 }
 0x719   :  { %666 = vadd.xlane.f32.xlu1 %v665_v57 }
 0x71a   :  { %663 = vadd.xlane.f32.xlu0 %v662_v58 }
 0x7a2   :  { %v659_v59 = vpop.xlane.xlu1 %658 }
 0x7a3   :  { %v669_v60 = vmul.f32 0.0625, %v659_v59  ;;  %v656_v61 = vpop.xlane.xlu0 %655 }
 0x7a4   :  { %v668_v62 = vmul.f32 0.0625, %v656_v61 }
 0x7a5   :  { %v673_v0 = vmul.f32 %v669_v60, %v669_v60  ;;  %v679_v13 = vsub.f32 %v651_v54, %v669_v60 }
 0x7a6   :  { %v667_v63 = vpop.xlane.xlu1 %666  ;;  %v672_v3 = vmul.f32 %v668_v62, %v668_v62  ;;  %v678_v15 = vsub.f32 %v646_v56, %v668_v62 }
 0x7a7   :  { %v671_v1 = vmul.f32 0.0625, %v667_v63  ;;  %v664_v2 = vpop.xlane.xlu0 %663 }
 0x7a8   :  { %v670_v4 = vmul.f32 0.0625, %v664_v2 }
 0x7a9   :  { %v675_v6 = vsub.f32 %v671_v1, %v673_v0 }
 0x7aa   :  { %v674_v8 = vsub.f32 %v670_v4, %v672_v3 }
 0x7ab   :  { %v677_v9 = vmax.f32 %v675_v6, 0.0 }
 0x7ac   :  { %v676_v10 = vmax.f32 %v674_v8, 0.0 }
 0x7ad   :  { %v681_v11 = vadd.f32 1e-05, %v677_v9 }
 0x7ae   :  { %v680_v12 = vadd.f32 1e-05, %v676_v10 }
 0x7af   :  { %871 = vrsqrt.f32 %v681_v11 }
 0x7b0   :  { %873 = vrsqrt.f32 %v680_v12 }
 0x7b9   :  { %v872_v14 = vpop.eup %871 }
 0x7ba   :  { %v874_v16 = vpop.eup %873  ;;  %v685_v17 = vmul.f32 %v872_v14, %v679_v13 }
 0x7bb   :  { %v684_v18 = vmul.f32 %v874_v16, %v678_v15 }
 0x7bc   :  { %687 = vst.msk [vmem:[#allocation7 + $0x8] sm:$0xff] %vm56_vm0, %v685_v17 }
 0x7bd   :  { %686 = vst.msk [vmem:[#allocation7] sm:$0xff] %vm56_vm0, %v684_v18 }
 0x7be   :  { %930 = shalt.err (!%p927_p6)
}
 0x7bf   :  { %s931_s25 = scalar_lea.hbm %s1089_s3, 256 }
 0x7c0   :  { %p932_p7 = scmp.ne.s32.totalorder %s1089_s3, %s931_s25  ;;  %p935_p8 = scmp.lt.u32.totalorder %s931_s25, %s1089_s3 }
 0x7c2   :  { %p937_p9 = pnand %p935_p8, %p932_p7 }
 0x7c4   :  { %940 = shalt.err (!%p937_p9)
}
 0x7c5   :  { %699 = dma.vmem_to_hbm [thread:$0]  %s694_s19, 256, %s1089_s3, [#allocation4], %s948_s22, %s948_s22, %s949_s23  }
 0x7c6   :  { %945 = dma.done.wait [#allocation4], 256  }
 0x7c7   :  { %946 = vsyncadd [#allocation4], 4294967040 }
 0x7c8   :  { %703 = vsyncpa [#allocation3], 1 }
 0x7c9   :  { %704 = vsyncpa [#allocation6], 1 }
 0x7ca   :  { %705 = vsyncpa [#allocation4], 1 }

</bundles_post_ra>
